<compile_context>
chip_gen: v5e
topology: v5e:2x2
jax: 0.10.0
libtpu: 0.0.40
codegen_flags: <defaults>
</compile_context>

<pallas_src>
import functools
import math

import numpy as np
import jax
import jax.numpy as jnp
from jax import lax
from jax.experimental import pallas as pl
from jax.experimental.pallas import tpu as pltpu


# ----------------------------------------------------------------------------
# Per-generation budgets & tiling helpers
# ----------------------------------------------------------------------------

def _budgets():
    """Return (block_bytes, vmem_limit_bytes) tuned per TPU generation.

    v5e/v6e have 128 MiB physical VMEM -> big blocks + 64 MiB scoped limit.
    v7x has 64 MiB per TensorCore -> conservative 2 MiB blocks / 40 MiB limit,
    which is also the safe default when the hardware query is unavailable.
    """
    vmem_cap = None
    try:
        vmem_cap = getattr(pltpu.get_tpu_info(), "vmem_capacity_bytes", None)
    except Exception:
        vmem_cap = None
    if vmem_cap is not None and vmem_cap >= 96 * 1024 * 1024:
        return 4 * 1024 * 1024, 64 * 1024 * 1024
    return 2 * 1024 * 1024, 40 * 1024 * 1024


def _round_up(x, m):
    return ((x + m - 1) // m) * m


def _unit_for_pos(pos):
    # Minimal block unit for a 3-D array: last dim -> lanes (128),
    # second-to-last -> sublanes (8), leading dim unconstrained.
    return (1, 8, 128)[pos]


def _fit_tile(full, unit, budget_elems):
    """Largest multiple of `unit` fitting `budget_elems`, or the full axis."""
    if full <= budget_elems:
        return full
    return max(unit, (budget_elems // unit) * unit)


def _ensure_two_steps(tile, full, unit):
    """If this tile would collapse the axis to a single grid step, halve it
    (rounded up to `unit`) so v7x's second TensorCore gets work."""
    if tile >= full and full > unit:
        return _round_up(-(-full // 2), unit)
    return tile


def _compiler_params(sem, vmem_limit):
    return pltpu.CompilerParams(dimension_semantics=sem,
                                vmem_limit_bytes=vmem_limit)


def _cost(x, extra_bytes=0):
    n = math.prod(x.shape)
    item = jnp.dtype(x.dtype).itemsize
    return pl.CostEstimate(flops=5 * n, transcendentals=n,
                           bytes_accessed=2 * n * item + extra_bytes)


# ----------------------------------------------------------------------------
# Resident path: the whole reduce axis fits one VMEM block (common case)
# ----------------------------------------------------------------------------

def _log_softmax_kernel(x_ref, o_ref, *, axis):
    """Numerically stable log-softmax over `axis` of the current VMEM block."""
    x = x_ref[...]
    if x.dtype != jnp.float32:
        x = x.astype(jnp.float32)   # exp accuracy; v5e VPU/EUP are f32-only
    m = jnp.max(x, axis=axis, keepdims=True)
    shifted = x - m
    lse = jnp.log(jnp.sum(jnp.exp(shifted), axis=axis, keepdims=True))
    o_ref[...] = (shifted - lse).astype(o_ref.dtype)


def _resident_last(x3d, block_bytes, vmem_limit):
    """dim==2: flatten leading axes -> (rows, c); lane reduce; tile rows."""
    a, b, c = x3d.shape
    rows = a * b
    x2d = x3d.reshape(rows, c)
    item = jnp.dtype(x3d.dtype).itemsize
    tr = _fit_tile(rows, 8, max(8, block_bytes // (c * item)))
    tr = _ensure_two_steps(tr, rows, 8)
    # TODO(synk): when c < 128 the stores are masked (vst.msk); a lane-dense
    # repacking of the output block would avoid the partial-store penalty.
    out = pl.pallas_call(
        functools.partial(_log_softmax_kernel, axis=-1),
        out_shape=jax.ShapeDtypeStruct((rows, c), x3d.dtype),
        grid=(pl.cdiv(rows, tr),),
        in_specs=[pl.BlockSpec((tr, c), lambda i: (i, 0))],
        out_specs=pl.BlockSpec((tr, c), lambda i: (i, 0)),
        compiler_params=_compiler_params(("parallel",), vmem_limit),
        cost_estimate=_cost(x3d),
    )(x2d)
    return out.reshape(a, b, c)


def _resident_mid(x3d, block_bytes, vmem_limit):
    """dim==1: keep layout; sublane reduce; tile leading & lane axes."""
    a, b, c = x3d.shape
    item = jnp.dtype(x3d.dtype).itemsize
    budget_elems = max(1, block_bytes // item)
    tc = _fit_tile(c, 128, max(128, budget_elems // b))
    ta = min(a, max(1, budget_elems // (b * tc)))
    if ta >= a and tc >= c:          # single grid step -> split for 2 TCs
        if a > 1:
            ta = -(-a // 2)
        elif c > 128:
            tc = _round_up(-(-c // 2), 128)
    return pl.pallas_call(
        functools.partial(_log_softmax_kernel, axis=1),
        out_shape=jax.ShapeDtypeStruct((a, b, c), x3d.dtype),
        grid=(pl.cdiv(a, ta), pl.cdiv(c, tc)),
        in_specs=[pl.BlockSpec((ta, b, tc), lambda i, j: (i, 0, j))],
        out_specs=pl.BlockSpec((ta, b, tc), lambda i, j: (i, 0, j)),
        compiler_params=_compiler_params(("parallel", "parallel"), vmem_limit),
        cost_estimate=_cost(x3d),
    )(x3d)


def _resident_lead(x3d, block_bytes, vmem_limit):
    """dim==0: keep layout; VPU accumulation over leading axis; tile (b, c)."""
    a, b, c = x3d.shape
    item = jnp.dtype(x3d.dtype).itemsize
    budget_elems = max(1, block_bytes // item)
    tc = _fit_tile(c, 128, max(128, budget_elems // a))
    tb = _fit_tile(b, 8, max(8, budget_elems // (a * tc)))
    if tb >= b and tc >= c:          # single grid step -> split for 2 TCs
        if b > 8:
            tb = _round_up(-(-b // 2), 8)
        elif c > 128:
            tc = _round_up(-(-c // 2), 128)
    return pl.pallas_call(
        functools.partial(_log_softmax_kernel, axis=0),
        out_shape=jax.ShapeDtypeStruct((a, b, c), x3d.dtype),
        grid=(pl.cdiv(b, tb), pl.cdiv(c, tc)),
        in_specs=[pl.BlockSpec((a, tb, tc), lambda i, j: (0, i, j))],
        out_specs=pl.BlockSpec((a, tb, tc), lambda i, j: (0, i, j)),
        compiler_params=_compiler_params(("parallel", "parallel"), vmem_limit),
        cost_estimate=_cost(x3d),
    )(x3d)


# ----------------------------------------------------------------------------
# Streaming path: reduce axis too large for one block -> online logsumexp
# ----------------------------------------------------------------------------

def _lse_stream_kernel(x_ref, lse_ref, m_sc, l_sc, *, axis, size, chunk):
    r = pl.program_id(2)

    @pl.when(r == 0)
    def _():
        m_sc[...] = jnp.full(m_sc.shape, -jnp.inf, dtype=m_sc.dtype)
        l_sc[...] = jnp.zeros(l_sc.shape, dtype=l_sc.dtype)

    x = x_ref[...]
    if x.dtype != jnp.float32:
        x = x.astype(jnp.float32)
    if size % chunk != 0:
        # Mask padded elements of the partial last reduce chunk.
        idx = lax.broadcasted_iota(jnp.int32, x.shape, axis) + r * chunk
        x = jnp.where(idx < size, x, -jnp.inf)

    m_chunk = jnp.max(x, axis=axis, keepdims=True)
    m_new = jnp.maximum(m_sc[...], m_chunk)
    l_sc[...] = (l_sc[...] * jnp.exp(m_sc[...] - m_new)
                 + jnp.sum(jnp.exp(x - m_new), axis=axis, keepdims=True))
    m_sc[...] = m_new

    @pl.when(r == pl.num_programs(2) - 1)
    def _():
        lse_ref[...] = m_sc[...] + jnp.log(l_sc[...])


def _finalize_kernel(x_ref, lse_ref, o_ref):
    x = x_ref[...]
    if x.dtype != jnp.float32:
        x = x.astype(jnp.float32)
    o_ref[...] = (x - lse_ref[...]).astype(o_ref.dtype)


def _streaming_log_softmax(x3d, axis, block_bytes, vmem_limit):
    """Two-pass log-softmax for reduce axes that don't fit one VMEM block:
    pass 1 streams reduce-axis chunks keeping an online (max, sum) -> lse;
    pass 2 streams x again and subtracts the broadcast lse."""
    shape = x3d.shape
    size_r = shape[axis]
    other = tuple(ax for ax in range(3) if ax != axis)
    item = jnp.dtype(x3d.dtype).itemsize
    budget_elems = max(1, block_bytes // item)

    # Non-reduce tiles: modest, lane/sublane friendly.
    caps = (8, 64, 512)
    t = [0, 0, 0]
    for ax in other:
        u = _unit_for_pos(ax)
        t[ax] = _fit_tile(shape[ax], u, max(u, caps[ax]))
    # Guarantee >=2 parallel steps when any non-reduce axis can be split.
    if all(t[ax] >= shape[ax] for ax in other):
        for ax in other:
            u = _unit_for_pos(ax)
            if shape[ax] > u:
                t[ax] = _round_up(-(-shape[ax] // 2), u)
                break

    r_unit = _unit_for_pos(axis)
    other_elems = t[other[0]] * t[other[1]]
    chunk = _fit_tile(size_r, r_unit,
                      max(r_unit, budget_elems // max(1, other_elems)))

    blk = list(t)
    blk[axis] = chunk
    lse_blk = list(t)
    lse_blk[axis] = 1
    lse_shape = list(shape)
    lse_shape[axis] = 1

    def x_map(i, j, r, _a=axis, _o=other):
        out = [0, 0, 0]
        out[_o[0]], out[_o[1]], out[_a] = i, j, r
        return tuple(out)

    def lse_map(i, j, r, _a=axis, _o=other):
        out = [0, 0, 0]
        out[_o[0]], out[_o[1]], out[_a] = i, j, 0
        return tuple(out)

    grid = (pl.cdiv(shape[other[0]], t[other[0]]),
            pl.cdiv(shape[other[1]], t[other[1]]),
            pl.cdiv(size_r, chunk))

    lse = pl.pallas_call(
        functools.partial(_lse_stream_kernel, axis=axis, size=size_r,
                          chunk=chunk),
        out_shape=jax.ShapeDtypeStruct(tuple(lse_shape), jnp.float32),
        grid=grid,
        in_specs=[pl.BlockSpec(tuple(blk), x_map)],
        out_specs=pl.BlockSpec(tuple(lse_blk), lse_map),
        scratch_shapes=[pltpu.VMEM(tuple(lse_blk), jnp.float32),
                        pltpu.VMEM(tuple(lse_blk), jnp.float32)],
        compiler_params=_compiler_params(
            ("parallel", "parallel", "arbitrary"), vmem_limit),
        cost_estimate=_cost(x3d),
    )(x3d)

    return pl.pallas_call(
        _finalize_kernel,
        out_shape=jax.ShapeDtypeStruct(shape, x3d.dtype),
        grid=grid,
        in_specs=[pl.BlockSpec(tuple(blk), x_map),
                  pl.BlockSpec(tuple(lse_blk), lse_map)],
        out_specs=pl.BlockSpec(tuple(blk), x_map),
        compiler_params=_compiler_params(("parallel",) * 3, vmem_limit),
        cost_estimate=_cost(x3d, extra_bytes=2 * math.prod(lse_shape) * 4),
    )(x3d, lse)


# ----------------------------------------------------------------------------
# Dispatcher & module wrapper
# ----------------------------------------------------------------------------

def _log_softmax_3d(x3d, axis):
    assert x3d.ndim == 3, "LayerLogSoftmaxTest draws dim from {0,1,2} -> 3-D"
    axis = axis % 3
    a, b, c = x3d.shape
    block_bytes, vmem_limit = _budgets()
    # Account for in-kernel f32 upcast temporaries when checking residency.
    eff_item = max(jnp.dtype(x3d.dtype).itemsize, 4)
    min_resident_elems = {2: 8 * c, 1: b * 128, 0: a * 8 * 128}[axis]
    if min_resident_elems * eff_item <= 2 * block_bytes:
        if axis == 2:
            return _resident_last(x3d, block_bytes, vmem_limit)
        if axis == 1:
            return _resident_mid(x3d, block_bytes, vmem_limit)
        return _resident_lead(x3d, block_bytes, vmem_limit)
    return _streaming_log_softmax(x3d, axis, block_bytes, vmem_limit)


class LayerLogSoftmaxPallas:
    """JAX/Pallas equivalent of LayerLogSoftmaxTest (3-D input, dim in {0,1,2})."""

    def __init__(self):
        # Deterministic stand-in for the module's np.random.randint(0, 3).
        self.dim = int(np.random.RandomState(0).randint(0, 3))

    def __call__(self, x):
        return _log_softmax_3d(x, self.dim)


if __name__ == "__main__":
    key = jax.random.PRNGKey(0)
    # Small 3-D input consistent with dim in {0, 1, 2}; last dim lane-dense.
    x = jax.random.normal(key, (4, 8, 128), dtype=jnp.float32)

    model = LayerLogSoftmaxPallas()
    y = jax.block_until_ready(model(x))
    np.testing.assert_allclose(
        np.asarray(y), np.asarray(jax.nn.log_softmax(x, axis=model.dim)),
        atol=1e-5, rtol=1e-5)

    # Every resident softmax-axis path (the module may draw any of them).
    for d in (0, 1, 2):
        out = jax.block_until_ready(_log_softmax_3d(x, d))
        np.testing.assert_allclose(
            np.asarray(out), np.asarray(jax.nn.log_softmax(x, axis=d)),
            atol=1e-5, rtol=1e-5)

    # bf16 input exercises the dtype-aware block sizing.
    xb = x.astype(jnp.bfloat16)
    outb = jax.block_until_ready(_log_softmax_3d(xb, 2))
    np.testing.assert_allclose(
        np.asarray(outb).astype(np.float32),
        np.asarray(jax.nn.log_softmax(xb.astype(jnp.float32), axis=2)),
        atol=1e-1, rtol=5e-2)

    # Streaming (online logsumexp) fallback, forced with a tiny block budget so
    # the reduce axis is processed in multiple chunks (incl. a masked partial
    # final chunk for dim==0).
    xs = jax.random.normal(jax.random.PRNGKey(1), (51, 16, 256),
                           dtype=jnp.float32)
    for d in (0, 1, 2):
        out = jax.block_until_ready(
            _streaming_log_softmax(xs, d, block_bytes=16 * 1024,
                                   vmem_limit=40 * 1024 * 1024))
        np.testing.assert_allclose(
            np.asarray(out), np.asarray(jax.nn.log_softmax(xs, axis=d)),
            atol=1e-5, rtol=1e-5)

    print("KERNEL_OK")
</pallas_src>

<mosaic_0001>
module attributes {stable_mosaic.version = 11 : i64} {
  func.func @_log_softmax_kernel(%arg0: i32, %arg1: i32, %arg2: memref<4x8x128xf32, #tpu.memory_space<vmem>>, %arg3: memref<4x8x128xf32, #tpu.memory_space<vmem>>) attributes {dimension_semantics = [#tpu.dimension_semantics<parallel>, #tpu.dimension_semantics<parallel>], iteration_bounds = array<i64: 1, 1>, scalar_prefetch = 0 : i64, scratch_operands = 0 : i64, tpu.core_type = #tpu.core_type<tc>, window_params = [{transform_indices = @transform_0, window_bounds = array<i64: 4, 8, 128>}, {transform_indices = @transform_1, window_bounds = array<i64: 4, 8, 128>}]} {
    %c0 = arith.constant 0 : index
    %c0_0 = arith.constant 0 : index
    %c0_1 = arith.constant 0 : index
    %0 = vector.load %arg2[%c0, %c0_0, %c0_1] : memref<4x8x128xf32, #tpu.memory_space<vmem>>, vector<4x8x128xf32>
    %cst = arith.constant dense<0xFF800000> : vector<8x128xf32>
    %1 = vector.multi_reduction <maximumf>, %0, %cst [0] : vector<4x8x128xf32> to vector<8x128xf32>
    %2 = vector.shape_cast %1 : vector<8x128xf32> to vector<1x8x128xf32>
    %3 = vector.broadcast %2 : vector<1x8x128xf32> to vector<4x8x128xf32>
    %4 = arith.subf %0, %3 : vector<4x8x128xf32>
    %5 = math.exp %4 : vector<4x8x128xf32>
    %cst_2 = arith.constant dense<0.000000e+00> : vector<8x128xf32>
    %6 = vector.multi_reduction <add>, %5, %cst_2 [0] : vector<4x8x128xf32> to vector<8x128xf32>
    %7 = vector.shape_cast %6 : vector<8x128xf32> to vector<1x8x128xf32>
    %8 = math.log %7 : vector<1x8x128xf32>
    %9 = vector.broadcast %8 : vector<1x8x128xf32> to vector<4x8x128xf32>
    %10 = arith.subf %4, %9 : vector<4x8x128xf32>
    %c0_3 = arith.constant 0 : index
    %c0_4 = arith.constant 0 : index
    %c0_5 = arith.constant 0 : index
    %11 = vector.load %arg3[%c0_3, %c0_4, %c0_5] : memref<4x8x128xf32, #tpu.memory_space<vmem>>, vector<4x8x128xf32>
    tpu.vector_store %arg3[%c0_3, %c0_4, %c0_5], %10 {strides = array<i32>} : memref<4x8x128xf32, #tpu.memory_space<vmem>>, vector<4x8x128xf32>,
    return
  }
  func.func @transform_0(%arg0: i32, %arg1: i32) -> (i32, i32, i32) {
    %c0_i32 = arith.constant 0 : i32
    %c0_i32_0 = arith.constant 0 : i32
    return %c0_i32, %arg0, %arg1 : i32, i32, i32
  }
  func.func @transform_1(%arg0: i32, %arg1: i32) -> (i32, i32, i32) {
    %c0_i32 = arith.constant 0 : i32
    %c0_i32_0 = arith.constant 0 : i32
    return %c0_i32, %arg0, %arg1 : i32, i32, i32
  }
}

</mosaic_0001>

<bundles_post_ra>
// kernel: tpu_custom_call.1
= control target key start
LH: loop header
LB: loop body
LE: loop exit
PB: predicated region body
PF: predicated region fallthrough
CT: control target
= control target key end

     0   :  { %6 = vsyncpa [#allocation3], 0  ;;  %s168_s0 = inlined_call_operand.hbm [shape: f32[4,8,128], index: 0, kind: input, shape index: {}]   ;;  %s169_s1 = inlined_call_operand.hbm [shape: f32[4,8,128], index: 1, kind: output, shape index: {}]  }
   0x1   :  { %7 = vsyncpa [#allocation4], 0  ;;  %s12_s8 = sshll.u32 %s168_s0, 4  ;;  %s142_s9 = smov [#allocation2]   ;;  %s13_s8 = int_to_ptr.hbm [resolvable:$true] %s12_s8 }
   0x2   :  { %s14_s10 = sshll.u32 %s142_s9, 4  ;;  %s143_s11 = smov 128   ;;  %s15_s10 = int_to_ptr.vmem [resolvable:$true] %s14_s10 }
   0x3   :  { %s144_s12 = smov 8  }
   0x4   :  { %20 = dma.hbm_to_vmem [thread:$0]  %s13_s8, 512, %s15_s10, [#allocation3], %s143_s11, %s143_s11, %s144_s12  }
   0x5   :  { %138 = dma.done.wait [#allocation3], 512  }
   0x6   :  { %139 = vsyncadd [#allocation3], 4294966784  ;;  %v25_v0 = vld [vmem:[#allocation2] sm:$0xff]  ;;  %v26_v1 = vld [vmem:[#allocation2 + $0x8] sm:$0xff]  ;;  %s145_s0 = smov [#allocation5]   ;;  %s63_s16 = sshll.u32 %s169_s1, 4  ;;  %s64_s16 = int_to_ptr.hbm [resolvable:$true] %s63_s16 }
   0x7   :  { %v27_v2 = vld [vmem:[#allocation2 + $0x10] sm:$0xff]  ;;  %v28_v3 = vld [vmem:[#allocation2 + $0x18] sm:$0xff]  ;;  %v29_v4 = vmax.f32 %v25_v0, %v26_v1  ;;  %s61_s13 = sshll.u32 %s145_s0, 4  ;;  %s62_s13 = int_to_ptr.vmem [resolvable:$true] %s61_s13 }
   0x8   :  { %v30_v5 = vmax.f32 %v27_v2, %v28_v3 }
   0xa   :  { %v31_v6 = vmax.f32 %v29_v4, %v30_v5 }
   0xc   :  { %v32_v7 = vsub.f32 %v25_v0, %v31_v6  ;;  %v33_v8 = vsub.f32 %v26_v1, %v31_v6  ;;  %v34_v9 = vsub.f32 %v27_v2, %v31_v6  ;;  %v35_v10 = vsub.f32 %v28_v3, %v31_v6 }
   0xe   :  { %v36_v11 = vmul.f32 1.442695, %v32_v7  ;;  %v38_v12 = vmul.f32 1.442695, %v33_v8  ;;  %v40_v13 = vmul.f32 1.442695, %v34_v9 }
   0xf   :  { %v42_v14 = vmul.f32 1.442695, %v35_v10 }
  0x10   :  { %80 = vpow2.f32 %v36_v11 }
  0x11   :  { %82 = vpow2.f32 %v38_v12 }
  0x12   :  { %84 = vpow2.f32 %v40_v13 }
  0x13   :  { %86 = vpow2.f32 %v42_v14 }
  0x16   :  { %v81_v15 = vpop.eup %80 }
  0x17   :  { %v83_v16 = vpop.eup %82 }
  0x18   :  { %v85_v17 = vpop.eup %84  ;;  %v44_v18 = vadd.f32 %v83_v16, %v81_v15 }
  0x19   :  { %v87_v19 = vpop.eup %86 }
  0x1a   :  { %v45_v20 = vadd.f32 %v85_v17, %v44_v18 }
  0x1c   :  { %v46_v21 = vadd.f32 %v87_v19, %v45_v20 }
  0x1e   :  { %88 = vlog2.f32 %v46_v21 }
  0x24   :  { %v89_v22 = vpop.eup %88 }
  0x25   :  { %v48_v23 = vmul.f32 0.6931472, %v89_v22 }
  0x27   :  { %v49_v24 = vsub.f32 %v32_v7, %v48_v23  ;;  %v50_v25 = vsub.f32 %v33_v8, %v48_v23  ;;  %v51_v26 = vsub.f32 %v34_v9, %v48_v23  ;;  %v52_v27 = vsub.f32 %v35_v10, %v48_v23 }
  0x29   :  { %53 = vst [vmem:[#allocation5] sm:$0xff] %v49_v24 }
  0x2a   :  { %54 = vst [vmem:[#allocation5 + $0x8] sm:$0xff] %v50_v25 }
  0x2b   :  { %55 = vst [vmem:[#allocation5 + $0x10] sm:$0xff] %v51_v26 }
  0x2c   :  { %56 = vst [vmem:[#allocation5 + $0x18] sm:$0xff] %v52_v27 }
  0x2d   :  { %69 = dma.vmem_to_hbm [thread:$0]  %s62_s13, 512, %s64_s16, [#allocation4], %s143_s11, %s143_s11, %s144_s12  }
  0x2e   :  { %140 = dma.done.wait [#allocation4], 512  }
  0x2f   :  { %141 = vsyncadd [#allocation4], 4294966784 }
  0x30   :  { %74 = vsyncpa [#allocation3], 1 }
  0x31   :  { %75 = vsyncpa [#allocation4], 1 }

</bundles_post_ra>
